<compile_context>
chip_gen: v5e
topology: v5e:2x2
jax: 0.10.0
libtpu: 0.0.40
codegen_flags: <defaults>
</compile_context>

<pallas_src>
import numpy as np
import jax
import jax.numpy as jnp
from jax.experimental import pallas as pl
from jax.experimental.pallas import tpu as pltpu


# ----------------------------------------------------------------------------- #
# Kernel
# ----------------------------------------------------------------------------- #
def _glb2_kernel(xg_ref, xv_ref, gm_ref, gmT_ref, wg_ref, wv_ref, wp_ref,
                 bias_ref, out_ref):
    """One batch tile: (TB, Wp) activations; weights resident in VMEM."""
    eps = 1e-5

    xg = xg_ref[...].astype(jnp.float32)          # (TB, Wp)
    xv = xv_ref[...].astype(jnp.float32)          # (TB, Wp)
    tb = xg.shape[0]

    gm = gm_ref[...]                              # (Wp, G), entries 1/cg on real channels
    gmT = gmT_ref[...]                            # (G, Wp), entries 1   on real channels

    # One sublane concat so the gate and value streams share the stat/broadcast dots.
    xcat = jnp.concatenate([xg, xv], axis=0)      # (2TB, Wp)

    # ---- GroupNorm statistics: two dots, no (4TB, Wp) stacking -----------------
    mean_g = jnp.dot(xcat, gm, preferred_element_type=jnp.float32)          # (2TB, G)
    msq_g = jnp.dot(xcat * xcat, gm, preferred_element_type=jnp.float32)    # (2TB, G)
    var_g = jnp.maximum(msq_g - mean_g * mean_g, 0.0)   # clamp f32 cancellation
    rstd_g = jax.lax.rsqrt(var_g + eps)                                      # (2TB, G)

    # ---- Broadcast stats back to channels: two (2TB, G)@(G, Wp) dots -----------
    rstd_w = jnp.dot(rstd_g, gmT, preferred_element_type=jnp.float32)        # (2TB, Wp)
    mrstd_w = jnp.dot(mean_g * rstd_g, gmT, preferred_element_type=jnp.float32)
    xn = xcat * rstd_w - mrstd_w                                             # (x-mean)*rstd

    g = xn[:tb].astype(jnp.bfloat16)
    v = xn[tb:].astype(jnp.bfloat16)

    # ---- grouped 1x1 convs as block-diagonal matmuls (bf16 MXU, f32 acc) -------
    hg = jnp.maximum(
        jnp.dot(g, wg_ref[...], preferred_element_type=jnp.float32), 0.0)
    # TODO(synk): nn.Dropout(0.1) is identity in eval mode; a training-mode path
    # would need pltpu.prng_seed / prng_random_bits masking on hg.
    hv = jnp.dot(v, wv_ref[...], preferred_element_type=jnp.float32)

    xx = (hg * hv).astype(jnp.bfloat16)
    out = jnp.dot(xx, wp_ref[...], preferred_element_type=jnp.float32) + bias_ref[...]
    out_ref[...] = out.astype(out_ref.dtype)


# ----------------------------------------------------------------------------- #
# Tiling / VMEM sizing helpers
# ----------------------------------------------------------------------------- #
def _round_up(x, m):
    return ((x + m - 1) // m) * m


def _vmem_capacity_bytes():
    try:
        info = pltpu.get_tpu_info()
        cap = getattr(info, "vmem_capacity_bytes", None)
        if cap:
            return int(cap)
    except Exception:
        pass
    return 64 << 20          # conservative fallback (v7x per-TC)


def _tile_vmem_bytes(tb, wp, hp, g):
    """Per-call VMEM footprint including Pallas's default 2x buffering of BOTH the
    streamed activation tiles and the constant-index_map ("resident") weights."""
    f32, bf16 = 4, 2
    # streamed tiles (double-buffered): xg/xv in bf16, out in f32
    stream = 2 * (2 * tb * wp * bf16) + 2 * (tb * wp * f32)
    # resident operands (also double-buffered by default)
    resident = 2 * (2 * wp * hp * bf16 + hp * wp * bf16 + wp * f32
                    + wp * g * f32 + g * wp * f32)
    # live in-kernel intermediates: xcat, x^2, rstd_w, mrstd_w, xn (f32),
    # bf16 g/v, hg/hv (f32), xx (bf16), out (f32), tiny (2TB,G) stats
    interm = (5 * 2 * tb * wp) * f32 + (2 * tb * wp) * bf16 \
        + (2 * tb * hp) * f32 + (tb * hp) * bf16 + (tb * wp) * f32 \
        + (6 * tb * g) * f32
    return stream + resident + interm


def _pick_tiling(b, wp, hp, g):
    """Pick (TB, Bp, vmem_limit) for the current chip generation."""
    capacity = _vmem_capacity_bytes()
    if capacity <= (64 << 20):        # v7x: 64 MiB physical per TC
        budget, limit_cap = 36 << 20, 56 << 20
    else:                             # v5e / v6e: 128 MiB physical
        budget, limit_cap = 72 << 20, 96 << 20

    def fits(tb):
        return _tile_vmem_bytes(tb, wp, hp, g) <= budget

    # Keep >= 2 grid steps when B allows (DMA/compute overlap; v7x 2-TC sharding).
    max_tb = min(512, b)
    if b >= 16:
        max_tb = min(max_tb, max(8, (b // 2 // 8) * 8))

    # Prefer multiples of 8 that divide B exactly -> no batch jnp.pad HBM copy.
    cands = [t for t in range(8, max_tb + 1, 8) if b % t == 0 and fits(t)]
    if cands:
        tb, bp = max(cands), b
    else:
        bp = _round_up(b, 8)
        tb = 8
        for t in range(8, min(512, bp) + 1, 8):
            if bp % t == 0 and fits(t) and (bp // t >= 2 or t == bp):
                tb = t

    vmem_limit = min(limit_cap,
                     max(32 << 20, int(1.4 * _tile_vmem_bytes(tb, wp, hp, g))))
    return tb, bp, vmem_limit


# ----------------------------------------------------------------------------- #
# Wrapper
# ----------------------------------------------------------------------------- #
def gated_linear_block2(xg, xv, params):
    """Forward of GatedLinearBlock2 (eval mode). xg, xv: (B, W) f32/bf16."""
    wg_p, wv_p, wpT_p, bias_p, gm_p, gmT_p = params
    B, W = xg.shape
    Wp, Hp = wg_p.shape
    G = gm_p.shape[1]

    # Pad channels to the lane-aligned width used by the (pre-padded) weights.
    # For production shapes W should already be a multiple of 128 (no-op here).
    if W != Wp:
        xg = jnp.pad(xg, ((0, 0), (0, Wp - W)))
        xv = jnp.pad(xv, ((0, 0), (0, Wp - W)))
    # bf16 activation I/O halves the per-step HBM traffic; stats stay f32 in-kernel.
    xg = xg.astype(jnp.bfloat16)
    xv = xv.astype(jnp.bfloat16)

    TB, Bp, vmem_limit = _pick_tiling(B, Wp, Hp, G)
    if Bp != B:   # only when no multiple-of-8 tile divides B
        xg = jnp.pad(xg, ((0, Bp - B), (0, 0)))
        xv = jnp.pad(xv, ((0, Bp - B), (0, 0)))

    # TODO(synk): for large W*H (weights no longer fitting VMEM) add a reduction
    # grid axis ("arbitrary") with a VMEM f32 accumulator so wg/wv/wp stream in
    # (tk, tn) tiles instead of being fully resident, and tile the grouped convs
    # per group to avoid the dense block-diagonal expansion.
    out = pl.pallas_call(
        _glb2_kernel,
        out_shape=jax.ShapeDtypeStruct((Bp, Wp), jnp.float32),
        grid=(Bp // TB,),
        in_specs=[
            pl.BlockSpec((TB, Wp), lambda i: (i, 0)),   # xg tile   (streamed)
            pl.BlockSpec((TB, Wp), lambda i: (i, 0)),   # xv tile   (streamed)
            pl.BlockSpec((Wp, G), lambda i: (0, 0)),    # membership*1/cg (resident)
            pl.BlockSpec((G, Wp), lambda i: (0, 0)),    # membership^T    (resident)
            pl.BlockSpec((Wp, Hp), lambda i: (0, 0)),   # gate weight     (resident)
            pl.BlockSpec((Wp, Hp), lambda i: (0, 0)),   # value weight    (resident)
            pl.BlockSpec((Hp, Wp), lambda i: (0, 0)),   # post weight     (resident)
            pl.BlockSpec((1, Wp), lambda i: (0, 0)),    # post bias       (resident)
        ],
        out_specs=pl.BlockSpec((TB, Wp), lambda i: (i, 0)),
        compiler_params=pltpu.CompilerParams(
            dimension_semantics=("parallel",),
            vmem_limit_bytes=vmem_limit),
    )(xg, xv, gm_p, gmT_p, wg_p, wv_p, wpT_p, bias_p)

    if Bp != B or Wp != W:
        out = out[:B, :W]
    return out


# ----------------------------------------------------------------------------- #
# Parameter construction (glue) + pure-JAX reference
# ----------------------------------------------------------------------------- #
def init_params(key, width, num_head, scale_act, param_dtype=jnp.bfloat16, lane=128):
    """Deterministic synthetic parameters matching the PyTorch module's shapes.

    Returns (kernel_params, ref_params): kernel params are lane-padded / bf16 /
    block-diagonal; ref params are the unpadded f32 dense equivalents.
    """
    H = width * scale_act
    cg = width // num_head            # in-channels per group
    og = H // num_head                # out-channels per group
    Wp = _round_up(width, lane)
    Hp = _round_up(H, lane)
    k1, k2, k3, k4 = jax.random.split(key, 4)

    # torch Conv1d(groups=num_head, bias=False) weight: (H, cg, 1)
    wg = np.asarray(jax.random.normal(k1, (H, cg), jnp.float32)) / np.sqrt(cg)
    wv = np.asarray(jax.random.normal(k2, (H, cg), jnp.float32)) / np.sqrt(cg)
    # torch Conv1d(H, width, 1) weight: (width, H, 1), bias (width,)
    wpw = np.asarray(jax.random.normal(k3, (width, H), jnp.float32)) / np.sqrt(H)
    bp = np.asarray(jax.random.normal(k4, (width,), jnp.float32)) * 0.01

    # Expand grouped conv weights into block-diagonal (width, H) matmul weights.
    wg_bd = np.zeros((width, H), np.float32)
    wv_bd = np.zeros((width, H), np.float32)
    gm = np.zeros((width, num_head), np.float32)     # mean op (entries 1/cg)
    gmb = np.zeros((width, num_head), np.float32)    # broadcast op (entries 1)
    for g in range(num_head):
        ci, co = g * cg, g * og
        wg_bd[ci:ci + cg, co:co + og] = wg[co:co + og, :].T
        wv_bd[ci:ci + cg, co:co + og] = wv[co:co + og, :].T
        gm[ci:ci + cg, g] = 1.0 / cg
        gmb[ci:ci + cg, g] = 1.0

    # Lane-pad everything once (zero rows/cols keep results exact on real channels).
    wg_p = np.zeros((Wp, Hp), np.float32); wg_p[:width, :H] = wg_bd
    wv_p = np.zeros((Wp, Hp), np.float32); wv_p[:width, :H] = wv_bd
    wpT_p = np.zeros((Hp, Wp), np.float32); wpT_p[:H, :width] = wpw.T
    bias_p = np.zeros((1, Wp), np.float32); bias_p[0, :width] = bp
    gm_p = np.zeros((Wp, num_head), np.float32); gm_p[:width] = gm
    gmT_p = np.zeros((num_head, Wp), np.float32); gmT_p[:, :width] = gmb.T

    kernel_params = (jnp.asarray(wg_p, param_dtype),     # gate weight (bf16)
                     jnp.asarray(wv_p, param_dtype),     # value weight (bf16)
                     jnp.asarray(wpT_p, param_dtype),    # post weight, transposed (bf16)
                     jnp.asarray(bias_p, jnp.float32),
                     jnp.asarray(gm_p, jnp.float32),
                     jnp.asarray(gmT_p, jnp.float32))
    ref_params = (jnp.asarray(wg_bd), jnp.asarray(wv_bd),
                  jnp.asarray(wpw.T), jnp.asarray(bp))
    return kernel_params, ref_params


def reference_forward(xg, xv, ref_params, num_head):
    """Pure-JAX f32 reference (mirrors the PyTorch forward in eval mode)."""
    wg_bd, wv_bd, wp_t, bias = ref_params

    def gn(x):
        B, W = x.shape
        cg = W // num_head
        xr = x.reshape(B, num_head, cg)
        mean = xr.mean(-1, keepdims=True)
        var = ((xr - mean) ** 2).mean(-1, keepdims=True)
        return ((xr - mean) / jnp.sqrt(var + 1e-5)).reshape(B, W)

    g = jnp.maximum(gn(xg) @ wg_bd, 0.0)
    v = gn(xv) @ wv_bd
    return (g * v) @ wp_t + bias[None, :]


if __name__ == "__main__":
    # small shapes consistent with the module: width=32, num_head=4, scale_act=2
    B, width, num_head, scale_act = 16, 32, 4, 2

    key = jax.random.PRNGKey(0)
    kxg, kxv, kp = jax.random.split(key, 3)
    xg = jax.random.normal(kxg, (B, width), jnp.float32)
    xv = jax.random.normal(kxv, (B, width), jnp.float32)
    kernel_params, ref_params = init_params(kp, width, num_head, scale_act)

    out = gated_linear_block2(xg, xv, kernel_params)   # grid=(2,) batch tiles of 8
    out = jax.block_until_ready(out)

    ref = reference_forward(xg, xv, ref_params, num_head)
    # Tolerance accounts for bf16 activation I/O and bf16 weights (f32 accumulation).
    np.testing.assert_allclose(np.asarray(out), np.asarray(ref),
                               rtol=5e-2, atol=5e-2)
    print("KERNEL_OK")
</pallas_src>

<mosaic_0001>
module attributes {stable_mosaic.version = 11 : i64} {
  func.func @_glb2_kernel(%arg0: i32, %arg1: memref<8x128xbf16, #tpu.memory_space<vmem>>, %arg2: memref<8x128xbf16, #tpu.memory_space<vmem>>, %arg3: memref<128x4xf32, #tpu.memory_space<vmem>>, %arg4: memref<4x128xf32, #tpu.memory_space<vmem>>, %arg5: memref<128x128xbf16, #tpu.memory_space<vmem>>, %arg6: memref<128x128xbf16, #tpu.memory_space<vmem>>, %arg7: memref<128x128xbf16, #tpu.memory_space<vmem>>, %arg8: memref<1x128xf32, #tpu.memory_space<vmem>>, %arg9: memref<8x128xf32, #tpu.memory_space<vmem>>) attributes {dimension_semantics = [#tpu.dimension_semantics<parallel>], iteration_bounds = array<i64: 2>, scalar_prefetch = 0 : i64, scratch_operands = 0 : i64, tpu.core_type = #tpu.core_type<tc>, window_params = [{transform_indices = @transform_0, window_bounds = array<i64: 8, 128>}, {transform_indices = @transform_1, window_bounds = array<i64: 8, 128>}, {pipeline_mode = #tpu.pipeline_mode<synchronous>, transform_indices = @transform_2, window_bounds = array<i64: 128, 4>}, {pipeline_mode = #tpu.pipeline_mode<synchronous>, transform_indices = @transform_3, window_bounds = array<i64: 4, 128>}, {pipeline_mode = #tpu.pipeline_mode<synchronous>, transform_indices = @transform_4, window_bounds = array<i64: 128, 128>}, {pipeline_mode = #tpu.pipeline_mode<synchronous>, transform_indices = @transform_5, window_bounds = array<i64: 128, 128>}, {pipeline_mode = #tpu.pipeline_mode<synchronous>, transform_indices = @transform_6, window_bounds = array<i64: 128, 128>}, {pipeline_mode = #tpu.pipeline_mode<synchronous>, transform_indices = @transform_7, window_bounds = array<i64: 1, 128>}, {transform_indices = @transform_8, window_bounds = array<i64: 8, 128>}]} {
    %c0 = arith.constant 0 : index
    %c0_0 = arith.constant 0 : index
    %0 = vector.load %arg1[%c0, %c0_0] : memref<8x128xbf16, #tpu.memory_space<vmem>>, vector<8x128xbf16>
    %1 = arith.extf %0 : vector<8x128xbf16> to vector<8x128xf32>
    %c0_1 = arith.constant 0 : index
    %c0_2 = arith.constant 0 : index
    %2 = vector.load %arg2[%c0_1, %c0_2] : memref<8x128xbf16, #tpu.memory_space<vmem>>, vector<8x128xbf16>
    %3 = arith.extf %2 : vector<8x128xbf16> to vector<8x128xf32>
    %c0_3 = arith.constant 0 : index
    %c0_4 = arith.constant 0 : index
    %4 = vector.load %arg3[%c0_3, %c0_4] : memref<128x4xf32, #tpu.memory_space<vmem>>, vector<128x4xf32>
    %c0_5 = arith.constant 0 : index
    %c0_6 = arith.constant 0 : index
    %5 = vector.load %arg4[%c0_5, %c0_6] : memref<4x128xf32, #tpu.memory_space<vmem>>, vector<4x128xf32>
    %6 = tpu.concatenate %1, %3 in 0 : vector<8x128xf32>, vector<8x128xf32> -> vector<16x128xf32>
    %cst = arith.constant dense<0.000000e+00> : vector<16x4xf32>
    %7 = tpu.matmul %6, %4, %cst {dimension_numbers = #tpu.dot_dimension_numbers<[1], [0], [0], [1], [0, 0, 1, 1], [], []>} : vector<16x128xf32>, vector<128x4xf32>, vector<16x4xf32> -> vector<16x4xf32>
    %8 = arith.mulf %6, %6 : vector<16x128xf32>
    %cst_7 = arith.constant dense<0.000000e+00> : vector<16x4xf32>
    %9 = tpu.matmul %8, %4, %cst_7 {dimension_numbers = #tpu.dot_dimension_numbers<[1], [0], [0], [1], [0, 0, 1, 1], [], []>} : vector<16x128xf32>, vector<128x4xf32>, vector<16x4xf32> -> vector<16x4xf32>
    %10 = arith.mulf %7, %7 : vector<16x4xf32>
    %11 = arith.subf %9, %10 : vector<16x4xf32>
    %cst_8 = arith.constant 0.000000e+00 : f32
    %12 = vector.broadcast %cst_8 : f32 to vector<16x4xf32>
    %13 = arith.maximumf %11, %12 : vector<16x4xf32>
    %cst_9 = arith.constant 9.99999974E-6 : f32
    %14 = vector.broadcast %cst_9 : f32 to vector<16x4xf32>
    %15 = arith.addf %13, %14 : vector<16x4xf32>
    %16 = math.rsqrt %15 : vector<16x4xf32>
    %cst_10 = arith.constant dense<0.000000e+00> : vector<16x128xf32>
    %17 = tpu.matmul %16, %5, %cst_10 {dimension_numbers = #tpu.dot_dimension_numbers<[1], [0], [0], [1], [0, 0, 1, 1], [], []>} : vector<16x4xf32>, vector<4x128xf32>, vector<16x128xf32> -> vector<16x128xf32>
    %18 = arith.mulf %7, %16 : vector<16x4xf32>
    %cst_11 = arith.constant dense<0.000000e+00> : vector<16x128xf32>
    %19 = tpu.matmul %18, %5, %cst_11 {dimension_numbers = #tpu.dot_dimension_numbers<[1], [0], [0], [1], [0, 0, 1, 1], [], []>} : vector<16x4xf32>, vector<4x128xf32>, vector<16x128xf32> -> vector<16x128xf32>
    %20 = arith.mulf %6, %17 : vector<16x128xf32>
    %21 = arith.subf %20, %19 : vector<16x128xf32>
    %22 = vector.extract_strided_slice %21 {offsets = [0, 0], sizes = [8, 128], strides = [1, 1]} : vector<16x128xf32> to vector<8x128xf32>
    %23 = arith.truncf %22 : vector<8x128xf32> to vector<8x128xbf16>
    %24 = vector.extract_strided_slice %21 {offsets = [8, 0], sizes = [8, 128], strides = [1, 1]} : vector<16x128xf32> to vector<8x128xf32>
    %25 = arith.truncf %24 : vector<8x128xf32> to vector<8x128xbf16>
    %c0_12 = arith.constant 0 : index
    %c0_13 = arith.constant 0 : index
    %26 = vector.load %arg5[%c0_12, %c0_13] : memref<128x128xbf16, #tpu.memory_space<vmem>>, vector<128x128xbf16>
    %cst_14 = arith.constant dense<0.000000e+00> : vector<8x128xf32>
    %27 = tpu.matmul %23, %26, %cst_14 {dimension_numbers = #tpu.dot_dimension_numbers<[1], [0], [0], [1], [0, 0, 1, 1], [], []>} : vector<8x128xbf16>, vector<128x128xbf16>, vector<8x128xf32> -> vector<8x128xf32>
    %cst_15 = arith.constant 0.000000e+00 : f32
    %28 = vector.broadcast %cst_15 : f32 to vector<8x128xf32>
    %29 = arith.maximumf %27, %28 : vector<8x128xf32>
    %c0_16 = arith.constant 0 : index
    %c0_17 = arith.constant 0 : index
    %30 = vector.load %arg6[%c0_16, %c0_17] : memref<128x128xbf16, #tpu.memory_space<vmem>>, vector<128x128xbf16>
    %cst_18 = arith.constant dense<0.000000e+00> : vector<8x128xf32>
    %31 = tpu.matmul %25, %30, %cst_18 {dimension_numbers = #tpu.dot_dimension_numbers<[1], [0], [0], [1], [0, 0, 1, 1], [], []>} : vector<8x128xbf16>, vector<128x128xbf16>, vector<8x128xf32> -> vector<8x128xf32>
    %32 = arith.mulf %29, %31 : vector<8x128xf32>
    %33 = arith.truncf %32 : vector<8x128xf32> to vector<8x128xbf16>
    %c0_19 = arith.constant 0 : index
    %c0_20 = arith.constant 0 : index
    %34 = vector.load %arg7[%c0_19, %c0_20] : memref<128x128xbf16, #tpu.memory_space<vmem>>, vector<128x128xbf16>
    %cst_21 = arith.constant dense<0.000000e+00> : vector<8x128xf32>
    %35 = tpu.matmul %33, %34, %cst_21 {dimension_numbers = #tpu.dot_dimension_numbers<[1], [0], [0], [1], [0, 0, 1, 1], [], []>} : vector<8x128xbf16>, vector<128x128xbf16>, vector<8x128xf32> -> vector<8x128xf32>
    %c0_22 = arith.constant 0 : index
    %c0_23 = arith.constant 0 : index
    %36 = vector.load %arg8[%c0_22, %c0_23] : memref<1x128xf32, #tpu.memory_space<vmem>>, vector<1x128xf32>
    %37 = vector.broadcast %36 : vector<1x128xf32> to vector<8x128xf32>
    %38 = arith.addf %35, %37 : vector<8x128xf32>
    %c0_24 = arith.constant 0 : index
    %c0_25 = arith.constant 0 : index
    %39 = vector.load %arg9[%c0_24, %c0_25] : memref<8x128xf32, #tpu.memory_space<vmem>>, vector<8x128xf32>
    tpu.vector_store %arg9[%c0_24, %c0_25], %38 {strides = array<i32>} : memref<8x128xf32, #tpu.memory_space<vmem>>, vector<8x128xf32>,
    return
  }
  func.func @transform_0(%arg0: i32) -> (i32, i32) {
    %c0_i32 = arith.constant 0 : i32
    %c0_i32_0 = arith.constant 0 : i32
    return %arg0, %c0_i32 : i32, i32
  }
  func.func @transform_1(%arg0: i32) -> (i32, i32) {
    %c0_i32 = arith.constant 0 : i32
    %c0_i32_0 = arith.constant 0 : i32
    return %arg0, %c0_i32 : i32, i32
  }
  func.func @transform_2(%arg0: i32) -> (i32, i32) {
    %c0_i32 = arith.constant 0 : i32
    %c0_i32_0 = arith.constant 0 : i32
    %c0_i32_1 = arith.constant 0 : i32
    return %c0_i32, %c0_i32_0 : i32, i32
  }
  func.func @transform_3(%arg0: i32) -> (i32, i32) {
    %c0_i32 = arith.constant 0 : i32
    %c0_i32_0 = arith.constant 0 : i32
    %c0_i32_1 = arith.constant 0 : i32
    return %c0_i32, %c0_i32_0 : i32, i32
  }
  func.func @transform_4(%arg0: i32) -> (i32, i32) {
    %c0_i32 = arith.constant 0 : i32
    %c0_i32_0 = arith.constant 0 : i32
    %c0_i32_1 = arith.constant 0 : i32
    return %c0_i32, %c0_i32_0 : i32, i32
  }
  func.func @transform_5(%arg0: i32) -> (i32, i32) {
    %c0_i32 = arith.constant 0 : i32
    %c0_i32_0 = arith.constant 0 : i32
    %c0_i32_1 = arith.constant 0 : i32
    return %c0_i32, %c0_i32_0 : i32, i32
  }
  func.func @transform_6(%arg0: i32) -> (i32, i32) {
    %c0_i32 = arith.constant 0 : i32
    %c0_i32_0 = arith.constant 0 : i32
    %c0_i32_1 = arith.constant 0 : i32
    return %c0_i32, %c0_i32_0 : i32, i32
  }
  func.func @transform_7(%arg0: i32) -> (i32, i32) {
    %c0_i32 = arith.constant 0 : i32
    %c0_i32_0 = arith.constant 0 : i32
    %c0_i32_1 = arith.constant 0 : i32
    return %c0_i32, %c0_i32_0 : i32, i32
  }
  func.func @transform_8(%arg0: i32) -> (i32, i32) {
    %c0_i32 = arith.constant 0 : i32
    %c0_i32_0 = arith.constant 0 : i32
    return %arg0, %c0_i32 : i32, i32
  }
}

</mosaic_0001>

<bundles_post_ra>
// kernel: tpu_custom_call.1
= control target key start
LH: loop header
LB: loop body
LE: loop exit
PB: predicated region body
PF: predicated region fallthrough
CT: control target
= control target key end

     0   :  { %s1619_s0 = inlined_call_operand.hbm [shape: bf16[16,128], index: 0, kind: input, shape index: {}]   ;;  %s1620_s1 = inlined_call_operand.hbm [shape: bf16[16,128], index: 1, kind: input, shape index: {}]   ;;  %s1621_s2 = inlined_call_operand.vmem [shape: f32[128,4], index: 2, kind: input, shape index: {}]   ;;  %s1622_s3 = inlined_call_operand.vmem [shape: f32[4,128], index: 3, kind: input, shape index: {}]   ;;  %s1623_s4 = inlined_call_operand.vmem [shape: bf16[128,128], index: 4, kind: input, shape index: {}]   ;;  %s1624_s5 = inlined_call_operand.vmem [shape: bf16[128,128], index: 5, kind: input, shape index: {}]   ;;  %s1625_s6 = inlined_call_operand.hbm [shape: bf16[128,128], index: 6, kind: input, shape index: {}]   ;;  %s1626_s7 = inlined_call_operand.vmem [shape: f32[1,128], index: 7, kind: input, shape index: {}]   ;;  %s1627_s8 = inlined_call_operand.hbm [shape: f32[16,128], index: 8, kind: output, shape index: {}]  }
   0x1   :  { %1634 = sst [smem:[#allocation19_spill]] %s1625_s6 }
   0x2   :  { %13 = vsyncpa [#allocation3], 0 }
   0x3   :  { %15 = vsyncpa [#allocation3 + $0x1], 0 }
   0x4   :  { %16 = vsyncpa [#allocation6], 0 }
   0x5   :  { %18 = vsyncpa [#allocation6 + $0x1], 0 }
   0x6   :  { %19 = vsyncpa [#allocation4], 0 }
   0x7   :  { %21 = vsyncpa [#allocation4 + $0x1], 0  ;;  %s1329_s27 = smov 0   ;;  %s1331_s28 = smov 0  }
   0x8   :  { %s1333_s29 = smov 0   ;;  %s1335_s30 = smov 0  }
   0x9 LB: > { %1635 = sst [smem:[#allocation13_spill]] %s1267_s27  ;;  %s1353_s12 = sadd.s32 4294967295, %s1279_s30   ;;  %s1279_s30 = sphi %s1335_s30, %s1652_s30   ;;  %s1275_s29 = sphi %s1333_s29, %s1654_s29   ;;  %s1271_s28 = sphi %s1331_s28, %s1656_s28   ;;  %s1267_s27 = sphi %s1329_s27, %s1655_s27  }
   0xa   : > { %1636 = sst [smem:[#allocation14_spill]] %s1275_s29  ;;  %p904_p0 = scmp.ge.s32.totalorder %s1279_s30, 1 }
   0xb   : > { %1637 = sst [smem:[#allocation15_spill]] %s1279_s30  ;;  %p48_p1 = scmp.eq.s32.totalorder %s1353_s12, 0 }
   0xc   : > { %s1638_s6 = sld [smem:[#allocation19_spill]]  ;;  %p236_p2 = scmp.lt.s32.totalorder %s1279_s30, 3 }
   0xd   : > { %s1281_s14 = smov [#allocation7]   ;;  %s1282_s16 = smov 64  }
   0xe   : > { %p1358_p3 = pnand %p904_p0, %p236_p2  ;;  %s261_s15 = sshll.u32 %s1281_s14, 4  ;;  %s262_s15 = int_to_ptr.vmem [resolvable:$true] %s261_s15 }
   0xf   : > { %s1283_s17 = smov 4   ;;  %s903_s18 = sadd.s32 4294967294, %s1279_s30  }
  0x10   : > { %p1056_p4 = pneg %p1358_p3  ;;  %s1369_s19 = sadd.s32 1, %s1279_s30  }
  0x11   : > { %1640 = sst [smem:[#allocation16_spill]] %s1369_s19  ;;  %s34_s20 = sadd.s32 1, %s1275_s29 }
  0x12   : > { %s259_s11 = sshll.u32 %s1638_s6, 4  ;;  %p1057_p6 = pnand %p1056_p4, %p48_p1  ;;  %s260_s11 = int_to_ptr.hbm [resolvable:$true] %s259_s11 }
  0x13   : > { %s31_s21 = ssub.s32 %s1279_s30, %s1369_s19  ;;  %p41_p7 = scmp.ne.s32.totalorder %s1275_s29, %s1271_s28 }
  0x14   : > { %1059 = dma.hbm_to_vmem [thread:$0]  (!%p1057_p6), %s260_s11, 1024, %s262_s15, [#allocation6], %s1282_s16, %s1282_s16, %s1283_s17  }
  0x15   : > { %p32_p8 = scmp.eq.s32.totalorder %s31_s21, 0  ;;  %p42_p9 = scmp.eq.s32.totalorder %s1279_s30, 0 }
  0x16   : > { %p47_p10 = scmp.ne.s32.totalorder %s1271_s28, %s1267_s27  ;;  %p223_p11 = scmp.eq.s32.totalorder %s1353_s12, 1 }
  0x17   : > { %s1381_s22 = scalar_select %p32_p8, %s1275_s29, %s34_s20  }
  0x18   : > { %p1383_p12 = por %p42_p9, %p41_p7  ;;  %p1389_p13 = por %p48_p1, %p47_p10 }
  0x19   : > { %1641 = sst [smem:[#allocation17_spill]] %s1381_s22  ;;  %p1393_p0 = por %p223_p11, %p41_p7 }
  0x1a   : > { %p229_p2 = scmp.eq.s32.totalorder %s903_s18, 1  ;;  %p1072_p4 = scmp.lt.s32.totalorder %s1279_s30, 2 }
  0x1b   : > { %s278_s26 = sand.u32 1, %s1275_s29   ;;  %s908_s11 = sshll.u32 %s1279_s30, 2 }
  0x1c   : > { %p1399_p6 = por %p229_p2, %p47_p10  ;;  %s907_s10 = sshll.u32 %s278_s26, 2 }
  0x1d   : > { %s286_s16 = scalar_lea.hbm %s1619_s0, %s908_s11  ;;  %s282_s20 = scalar_lea.vmem [#allocation2], %s907_s10 }
  0x1e   : > { %s1645_s9 = scalar_select %p1399_p6, 1, 0 }
  0x1f   : > { %s288_s17 = sshll.u32 %s286_s16, 4  ;;  %s290_s21 = sshll.u32 %s282_s20, 4  ;;  %s289_s17 = int_to_ptr.hbm [resolvable:$true] %s288_s17  ;;  %s291_s21 = int_to_ptr.vmem [resolvable:$true] %s290_s21 }
  0x20   : > { %1646 = sst [smem:[#allocation18_spill]] %s1645_s9  ;;  %p1409_p7 = pnand %p1072_p4, %p1383_p12 }
  0x21   : > { %s305_s29 = scalar_lea.hbm %s1620_s1, %s908_s11  ;;  %s297_s19 = sand.u32 1, %s1279_s30  }
  0x22   : > { %s279_s9 = scalar_lea.sflag [#allocation3], %s278_s26  ;;  %s1145_s14 = sshra.s32 %s289_s17, 4  ;;  %s1146_s14 = int_to_ptr.hbm [resolvable:$true] %s1145_s14 }
  0x23   : > { %s1147_s15 = scalar_lea.hbm %s1146_s14, 4  ;;  %p1149_p9 = pneg %p1409_p7 }
  0x24   : > { %p1148_p8 = scmp.ne.s32.totalorder %s1146_s14, %s1147_s15  ;;  %s1152_s20 = scalar_lea.hbm %s1619_s0, 8 }
  0x25   : > { %p1153_p12 = scmp.lt.s32.totalorder %s1146_s14, %s1619_s0  ;;  %p1154_p2 = scmp.lt.s32.totalorder %s1152_s20, %s1147_s15 }
  0x26   : > { %p1150_p10 = pnand %p1149_p9, %p1148_p8 }
  0x27   : > { %p1155_p4 = por %p1154_p2, %p1153_p12 }
  0x28   : > { %p1151_p11 = pneg %p1150_p10 }
  0x2a   : > { %p1156_p5 = pnand %p1155_p4, %p1151_p11 }
  0x2c   : > { %1159 = shalt.err (!%p1156_p5)
}
  0x2d   : > { %1063 = dma.hbm_to_vmem [thread:$0]  (!%p1409_p7), %s289_s17, 64, %s291_s21, %s279_s9  }
  0x2e   : > { %s307_s26 = sshll.u32 %s305_s29, 4  ;;  %s301_s11 = scalar_lea.vmem [#allocation5], %s907_s10  ;;  %s308_s26 = int_to_ptr.hbm [resolvable:$true] %s307_s26 }
  0x2f   : > { %s309_s30 = sshll.u32 %s301_s11, 4  ;;  %s298_s27 = scalar_lea.sflag [#allocation6], %s297_s19  ;;  %s310_s30 = int_to_ptr.vmem [resolvable:$true] %s309_s30 }
  0x30   : > { %s1175_s23 = sshra.s32 %s308_s26, 4  ;;  %s1182_s20 = scalar_lea.hbm %s1620_s1, 8  ;;  %s1176_s23 = int_to_ptr.hbm [resolvable:$true] %s1175_s23 }
  0x31   : > { %s1177_s16 = scalar_lea.hbm %s1176_s23, 4  ;;  %p1183_p5 = scmp.lt.s32.totalorder %s1176_s23, %s1620_s1 }
  0x32   : > { %p1178_p8 = scmp.ne.s32.totalorder %s1176_s23, %s1177_s16  ;;  %p1184_p11 = scmp.lt.s32.totalorder %s1182_s20, %s1177_s16 }
  0x34   : > { %p1180_p10 = pnand %p1178_p8, %p1149_p9  ;;  %p1185_p2 = por %p1184_p11, %p1183_p5 }
  0x36   : > { %p1181_p12 = pneg %p1180_p10 }
  0x38   : > { %p1186_p4 = pnand %p1185_p2, %p1181_p12 }
  0x3a   : > { %1189 = shalt.err (!%p1186_p4)
}
  0x3b   : > { %1066 = dma.hbm_to_vmem [thread:$0]  (!%p1409_p7), %s308_s26, 64, %s310_s30, %s298_s27  }
  0x3c   : > { %318 = sbr.rel (%p1358_p3) target bundleno = 671 (0x29f), region = 52  ;;  %s1444_s29 = sand.u32 (!%p1358_p3), 1, %s1271_s28  }
  0x3d   : > { %s912_s19 = sshll.u32 (!%p1358_p3), %s1444_s29, 2  ;;  %s321_s10 = scalar_lea.sflag (!%p1358_p3), [#allocation3], %s1444_s29 }
  0x3e   : > { %s1448_s17 = scalar_lea.vmem (!%p1358_p3), [#allocation2], %s912_s19 }
  0x41   : > { %1250 = dma.done.wait (%p1389_p13), %s321_s10, 64  }
  0x42   : > { %1252 = vsyncadd (%p1389_p13), %s321_s10, 4294967232  ;;  %s330_s27 = sand.u32 1, %s1353_s12   ;;  %s1455_s13 = scalar_lea.vmem [#allocation5], %s912_s19 }
  0x43   : > { %s331_s30 = scalar_lea.sflag [#allocation6], %s330_s27 }
  0x44   : > { %1254 = dma.done.wait (%p1389_p13), %s331_s30, 64  }
  0x45   : > { %1256 = vsyncadd (%p1389_p13), %s331_s30, 4294967232 }
  0x46   : > { %1258 = dma.done.wait (%p48_p1), [#allocation6], 1024  }
  0x47   : > { %1260 = vsyncadd (%p48_p1), [#allocation6], 4294966272  ;;  %v397_v0 = vld [vmem:[%s1621_s2 + $0x78] sm:$0xff]  ;;  %v396_v1 = vld [vmem:[%s1621_s2 + $0x70] sm:$0xff]  ;;  %vm482_vm0 = vcmask 1043456   ;;  %vm475_vm3 = vcmask 31744  }
  0x48   : > { %399 = vmatpush.msra.mxu0 %v397_v0  ;;  %424 = vmatpush.msra.mxu1 %v397_v0  ;;  %v395_v2 = vld [vmem:[%s1621_s2 + $0x68] sm:$0xff]  ;;  %v394_v3 = vld [vmem:[%s1621_s2 + $0x60] sm:$0xff]  ;;  %v393_v4 = vld [vmem:[%s1621_s2 + $0x58] sm:$0xff]  ;;  %s1019_s6 = sshll.u32 %s1353_s12, 3  ;;  %s915_s9 = sshll.u32 %s1444_s29, 3 }
  0x49   : > { %v392_v5 = vld [vmem:[%s1621_s2 + $0x50] sm:$0xff]  ;;  %v391_v6 = vld [vmem:[%s1621_s2 + $0x48] sm:$0xff]  ;;  %v390_v7 = vld [vmem:[%s1621_s2 + $0x40] sm:$0xff]  ;;  %s796_s10 = scalar_lea.hbm %s1627_s8, %s1019_s6  ;;  %s377_s30 = scalar_lea.vmem [#allocation8], %s915_s9 }
  0x4a   : > { %400 = vmatpush.msra.mxu0 %v396_v1  ;;  %425 = vmatpush.msra.mxu1 %v396_v1  ;;  %v389_v8 = vld [vmem:[%s1621_s2 + $0x38] sm:$0xff]  ;;  %v388_v9 = vld [vmem:[%s1621_s2 + $0x30] sm:$0xff]  ;;  %v387_v10 = vld [vmem:[%s1621_s2 + $0x28] sm:$0xff]  ;;  %s798_s21 = sshll.u32 %s377_s30, 4  ;;  %s800_s18 = sshll.u32 %s796_s10, 4  ;;  %s799_s21 = int_to_ptr.vmem [resolvable:$true] %s798_s21  ;;  %s801_s18 = int_to_ptr.hbm [resolvable:$true] %s800_s18 }
  0x4b   : > { %v386_v11 = vld [vmem:[%s1621_s2 + $0x20] sm:$0xff]  ;;  %v385_v13 = vld [vmem:[%s1621_s2 + $0x18] sm:$0xff]  ;;  %v384_v14 = vld [vmem:[%s1621_s2 + $0x10] sm:$0xff]  ;;  %s786_s22 = scalar_lea.sflag [#allocation4], %s1444_s29  ;;  %s1219_s12 = sshra.s32 %s801_s18, 4  ;;  %s1220_s12 = int_to_ptr.hbm [resolvable:$true] %s1219_s12 }
  0x4c   : > { %401 = vmatpush.msra.mxu0 %v395_v2  ;;  %426 = vmatpush.msra.mxu1 %v395_v2  ;;  %v378_v12 = vld [vmem:[%s1448_s17] sm:$0xf]  ;;  %v383_v16 = vld [vmem:[%s1621_s2 + $0x8] sm:$0xff]  ;;  %v1029_v28 = vld [vmem:[%s1623_s4 + $0x38] sm:$0xff]  ;;  %s1221_s26 = scalar_lea.hbm %s1220_s12, 8  ;;  %s1225_s24 = scalar_lea.hbm %s1627_s8, 16 }
  0x4d   : > { %v1508_v15 = vunpack.c.l.bf16 %v378_v12  ;;  %v382_v17 = vld [vmem:[%s1621_s2] sm:$0xff]  ;;  %v380_v19 = vld [vmem:[%s1455_s13] sm:$0xf]  ;;  %v1037_v29 = vld [vmem:[%s1624_s5 + $0x38] sm:$0xff]  ;;  %p1222_p1 = scmp.ne.s32.totalorder %s1220_s12, %s1221_s26  ;;  %p1226_p7 = scmp.lt.s32.totalorder %s1220_s12, %s1627_s8 }
  0x4e   : > { %402 = vmatpush.msra.mxu0 %v394_v3  ;;  %427 = vmatpush.msra.mxu1 %v394_v3  ;;  %v1520_v20 = vunpack.c.l.bf16 %v380_v19  ;;  %v398_v22 = vld [vmem:[%s1622_s3] sm:$0xf]  ;;  %v1028_v31 = vld [vmem:[%s1623_s4 + $0x30] sm:$0xff]  ;;  %v1027_v37 = vld [vmem:[%s1623_s4 + $0x28] sm:$0xff]  ;;  %p1227_p9 = scmp.lt.s32.totalorder %s1225_s24, %s1221_s26 }
  0x4f   : > { %v422_v18 = vmul.f32 %v1508_v15, %v1508_v15  ;;  %916 = vmatpush.msk.msra.mxu2 %vm482_vm0, %v398_v22  ;;  %919 = vmatpush.msk.msra.mxu3 %vm482_vm0, %v398_v22  ;;  %v1036_v34 = vld [vmem:[%s1624_s5 + $0x30] sm:$0xff]  ;;  %v1035_v38 = vld [vmem:[%s1624_s5 + $0x28] sm:$0xff]  ;;  %v1026_v42 = vld [vmem:[%s1623_s4 + $0x20] sm:$0xff]  ;;  %p1223_p3 = pnand %p1222_p1, %p1393_p0 }
  0x50   : > { %403 = vmatpush.msra.mxu0 %v393_v4  ;;  %428 = vmatpush.msra.mxu1 %v393_v4  ;;  %v423_v21 = vmul.f32 %v1520_v20, %v1520_v20  ;;  %v1034_v44 = vld [vmem:[%s1624_s5 + $0x20] sm:$0xff]  ;;  %v1025_v46 = vld [vmem:[%s1623_s4 + $0x18] sm:$0xff]  ;;  %v1024_v52 = vld [vmem:[%s1623_s4 + $0x10] sm:$0xff]  ;;  %p1228_p8 = por %p1227_p9, %p1226_p7 }
  0x51   : > { %610 = vmatpush.bf16.msrb.mxu2 %v1029_v28  ;;  %688 = vmatpush.bf16.msrb.mxu3 %v1037_v29  ;;  %v1023_v61 = vld [vmem:[%s1623_s4 + $0x8] sm:$0xff]  ;;  %v1033_v62 = vld [vmem:[%s1624_s5 + $0x18] sm:$0xff]  ;;  %v1022_v63 = vld [vmem:[%s1623_s4] sm:$0xff]  ;;  %p1224_p13 = pneg %p1223_p3 }
  0x52   : > { %404 = vmatpush.msra.mxu0 %v392_v5  ;;  %429 = vmatpush.msra.mxu1 %v392_v5  ;;  %v1032_v0 = vld [vmem:[%s1624_s5 + $0x10] sm:$0xff]  ;;  %v1031_v1 = vld [vmem:[%s1624_s5 + $0x8] sm:$0xff]  ;;  %v1030_v2 = vld [vmem:[%s1624_s5] sm:$0xff] }
  0x53   : > { %v1045_v3 = vld [vmem:[#allocation7 + $0x38] sm:$0xff]  ;;  %v1044_v4 = vld [vmem:[#allocation7 + $0x30] sm:$0xff]  ;;  %v1043_v5 = vld [vmem:[#allocation7 + $0x28] sm:$0xff]  ;;  %p1229_p10 = pnand %p1228_p8, %p1224_p13 }
  0x54   : > { %405 = vmatpush.msra.mxu0 %v391_v6  ;;  %430 = vmatpush.msra.mxu1 %v391_v6  ;;  %v1042_v6 = vld [vmem:[#allocation7 + $0x20] sm:$0xff]  ;;  %v1040_v19 = vld [vmem:[#allocation7 + $0x10] sm:$0xff] }
  0x55   : > { %611 = vmatpush.bf16.msrb.mxu2 %v1028_v31  ;;  %689 = vmatpush.bf16.msrb.mxu3 %v1036_v34  ;;  %v1038_v22 = vld [vmem:[#allocation7] sm:$0xff]  ;;  %v1110_v28 = vld [vmem:[%s1626_s7] ss:$0 sm:$0xff] }
  0x56   : > { %406 = vmatpush.msra.mxu0 %v390_v7  ;;  %431 = vmatpush.msra.mxu1 %v390_v7  ;;  %v1041_v7 = vld [vmem:[#allocation7 + $0x18] sm:$0xff] }
  0x58   : > { %407 = vmatpush.msra.mxu0 %v389_v8  ;;  %432 = vmatpush.msra.mxu1 %v389_v8 }
  0x59   : > { %612 = vmatpush.bf16.msrb.mxu2 %v1027_v37  ;;  %690 = vmatpush.bf16.msrb.mxu3 %v1035_v38 }
  0x5a   : > { %408 = vmatpush.msra.mxu0 %v388_v9  ;;  %433 = vmatpush.msra.mxu1 %v388_v9 }
  0x5c   : > { %409 = vmatpush.msra.mxu0 %v387_v10  ;;  %434 = vmatpush.msra.mxu1 %v387_v10 }
  0x5d   : > { %613 = vmatpush.bf16.msrb.mxu2 %v1026_v42  ;;  %691 = vmatpush.bf16.msrb.mxu3 %v1034_v44 }
  0x5e   : > { %410 = vmatpush.msra.mxu0 %v386_v11  ;;  %435 = vmatpush.msra.mxu1 %v386_v11 }
  0x60   : > { %411 = vmatpush.msra.mxu0 %v385_v13  ;;  %436 = vmatpush.msra.mxu1 %v385_v13 }
  0x61   : > { %614 = vmatpush.bf16.msrb.mxu2 %v1025_v46  ;;  %692 = vmatpush.bf16.msrb.mxu3 %v1033_v62 }
  0x62   : > { %412 = vmatpush.msra.mxu0 %v384_v14  ;;  %437 = vmatpush.msra.mxu1 %v384_v14 }
  0x64   : > { %413 = vmatpush.msra.mxu0 %v383_v16  ;;  %438 = vmatpush.msra.mxu1 %v383_v16 }
  0x65   : > { %615 = vmatpush.bf16.msrb.mxu2 %v1024_v52  ;;  %693 = vmatpush.bf16.msrb.mxu3 %v1032_v0 }
  0x66   : > { %414 = vmatpush.msra.mxu0 %v382_v17  ;;  %439 = vmatpush.msra.mxu1 %v382_v17 }
  0x67   : > { %415 = vmatmul.f32.vlgmr.msra.gmra.mxu0 %v1508_v15  ;;  %440 = vmatmul.f32.vlgmr.msra.gmra.mxu1 %v422_v18 }
  0x68   : > { %771 = vmatpush.bf16.msrb.mxu0 %v1045_v3 }
  0x69   : > { %616 = vmatpush.bf16.msrb.mxu2 %v1023_v61  ;;  %694 = vmatpush.bf16.msrb.mxu3 %v1031_v1 }
  0x6c   : > { %772 = vmatpush.bf16.msrb.mxu0 %v1044_v4 }
  0x6d   : > { %617 = vmatpush.bf16.msrb.mxu2 %v1022_v63  ;;  %695 = vmatpush.bf16.msrb.mxu3 %v1030_v2 }
  0x6f   : > { %418 = vmatmul.f32.gmra.mxu0 %v1520_v20  ;;  %443 = vmatmul.f32.gmra.mxu1 %v423_v21  ;;  %v1039_v21 = vld [vmem:[#allocation7 + $0x8] sm:$0xff] }
  0x70   : > { %773 = vmatpush.bf16.msrb.mxu0 %v1043_v5 }
  0x74   : > { %774 = vmatpush.bf16.msrb.mxu0 %v1042_v6 }
  0x78   : > { %775 = vmatpush.bf16.msrb.mxu0 %v1041_v7 }
  0x7c   : > { %776 = vmatpush.bf16.msrb.mxu0 %v1040_v19 }
  0x80   : > { %777 = vmatpush.bf16.msrb.mxu0 %v1039_v21 }
  0x84   : > { %778 = vmatpush.bf16.msrb.mxu0 %v1038_v22 }
  0xe4   : > { %v416_v23 = vpop.f32.mrf.mxu0  ;;  %v441_v24 = vpop.f32.mrf.mxu1 }
  0xe5   : > { %v447_v25 = vmul.f32 %v416_v23, %v416_v23 }
  0xe7   : > { %v449_v26 = vsub.f32 %v441_v24, %v447_v25 }
  0xe9   : > { %v451_v27 = vmax.f32 %v449_v26, 0.0 }
  0xeb   : > { %v453_v30 = vadd.f32 1e-05, %v451_v27 }
  0xec   : > { %v419_v32 = vpop.f32.mrf.mxu0  ;;  %v444_v33 = vpop.f32.mrf.mxu1 }
  0xed   : > { %1111 = vrsqrt.f32 %v453_v30  ;;  %v448_v35 = vmul.f32 %v419_v32, %v419_v32  ;;  %vm461_vm2 = vweird.f32 %v453_v30 }
  0xef   : > { %v450_v36 = vsub.f32 %v444_v33, %v448_v35 }
  0xf1   : > { %v452_v39 = vmax.f32 %v450_v36, 0.0 }
  0xf3   : > { %v1112_v40 = vpop.eup %1111  ;;  %v454_v41 = vadd.f32 1e-05, %v452_v39 }
  0xf4   : > { %v456_v43 = vmul.f32 %v1112_v40, %v453_v30  ;;  %vm462_vm1 = vweird.f32 %v1112_v40 }
  0xf5   : > { %1113 = vrsqrt.f32 %v454_v41  ;;  %vm463_vm4 = vmor %vm461_vm2, %vm462_vm1  ;;  %vm471_vm6 = vweird.f32 %v454_v41 }
  0xf6   : > { %v457_v45 = vmul.f32 %v1112_v40, %v456_v43 }
  0xf8   : > { %v458_v47 = vmul.f32 0.5, %v457_v45 }
  0xfa   : > { %v459_v48 = vsub.f32 1.5, %v458_v47 }
  0xfb   : > { %v1114_v49 = vpop.eup %1113 }
  0xfc   : > { %v466_v50 = vmul.f32 %v1114_v49, %v454_v41  ;;  %v460_v51 = vmul.f32 %v1112_v40, %v459_v48  ;;  %vm472_vm5 = vweird.f32 %v1114_v49 }
  0xfd   : > { %vm473_vm7 = vmor %vm471_vm6, %vm472_vm5 }
  0xfe   : > { %v467_v53 = vmul.f32 %v1114_v49, %v466_v50  ;;  %v464_v54 = vsel %vm463_vm4, %v1112_v40, %v460_v51 }
  0xff   : > { %917 = vmatmul.msk.f32.vlgmr.msra.gmra.mxu2 %vm475_vm3, %v464_v54  ;;  %v509_v55 = vmul.f32 %v464_v54, %v416_v23 }
 0x100   : > { %v468_v56 = vmul.f32 0.5, %v467_v53 }
 0x101   : > { %920 = vmatmul.msk.f32.vlgmr.msra.gmra.mxu3 %vm475_vm3, %v509_v55 }
 0x102   : > { %v469_v57 = vsub.f32 1.5, %v468_v56 }
 0x104   : > { %v470_v58 = vmul.f32 %v1114_v49, %v469_v57 }
 0x106   : > { %v474_v59 = vsel %vm473_vm7, %v1114_v49, %v470_v58 }
 0x107   : > { %918 = vmatmul.msk.f32.gmra.mxu2 %vm475_vm3, %v474_v59  ;;  %v510_v60 = vmul.f32 %v474_v59, %v419_v32 }
 0x109   : > { %921 = vmatmul.msk.f32.gmra.mxu3 %vm475_vm3, %v510_v60 }
 0x182   : > { %v503_v8 = vpop.f32.mrf.mxu2 }
 0x183   : > { %v540_v9 = vmul.f32 %v503_v8, %v1508_v15 }
 0x184   : > { %v534_v10 = vpop.f32.mrf.mxu3 }
 0x185   : > { %v542_v11 = vsub.f32 %v540_v9, %v534_v10 }
 0x187   : > { %v544_v12 = vpack.c.bf16 %v542_v11, %v542_v11 }
 0x189   : > { %618 = vmatmul.bf16.vlgmr.msrb.gmra.mxu2 %v544_v12 }
 0x18a   : > { %v506_v13 = vpop.f32.mrf.mxu2 }
 0x18b   : > { %v541_v14 = vmul.f32 %v506_v13, %v1520_v20 }
 0x18c   : > { %v537_v16 = vpop.f32.mrf.mxu3 }
 0x18d   : > { %v543_v17 = vsub.f32 %v541_v14, %v537_v16 }
 0x18f   : > { %v545_v18 = vpack.c.bf16 %v543_v17, %v543_v17 }
 0x191   : > { %696 = vmatmul.bf16.vlgmr.msrb.gmra.mxu3 %v545_v18 }
 0x20c   : > { %v619_v15 = vpop.f32.mrf.mxu2 }
 0x20d   : > { %v623_v23 = vmax.f32 %v619_v15, 0.0 }
 0x214   : > { %v621_v24 = vpop.f32.mrf.mxu2  ;;  %v697_v25 = vpop.f32.mrf.mxu3 }
 0x215   : > { %v701_v26 = vmul.f32 %v697_v25, %v623_v23 }
 0x217   : > { %v702_v27 = vpack.c.bf16 %v701_v26, %v701_v26 }
 0x219   : > { %779 = vmatmul.bf16.vlgmr.msrb.gmra.mxu0 %v702_v27 }
 0x21c   : > { %v699_v20 = vpop.f32.mrf.mxu3 }
 0x296   : > { %v780_v29 = vpop.f32.mrf.mxu0 }
 0x297   : > { %v781_v30 = vadd.f32 %v1110_v28, %v780_v29 }
 0x299   : > { %784 = vst [vmem:[%s377_s30] sm:$0xff] %v781_v30 }
 0x29a   : > { %1232 = shalt.err (!%p1229_p10)
}
 0x29b   : > { %1054 = dma.vmem_to_hbm [thread:$0]  (%p1393_p0), %s799_s21, 128, %s801_s18, %s786_s22  }
 0x29e   : > { %v782_v31 = vpop.f32.mrf.mxu0 }
 0x29f PF: > { %s1648_s29 = sld [smem:[#allocation13_spill]] }
 0x2a0   : > { %s1650_s20 = sld [smem:[#allocation15_spill]] }
 0x2a5   : > { %s812_s6 = sand.u32 1, %s1648_s29  }
 0x2a6   : > { %p1651_p12 = scmp.ge.s32.totalorder %s1650_s20, 2  ;;  %s813_s9 = scalar_lea.sflag [#allocation4], %s812_s6 }
 0x2a8   : > { %p1068_p5 = pnand %p1651_p12, %p1399_p6 }
 0x2aa   : > { %p1069_p11 = pneg %p1068_p5 }
 0x2ac   : > { %1262 = dma.done.wait (%p1069_p11), %s813_s9, 128  }
 0x2ad   : > { %1264 = vsyncadd (%p1069_p11), %s813_s9, 4294967168  ;;  %s1652_s30 = sld [smem:[#allocation16_spill]]  ;;  %s1655_s27 = smov %s1271_s28 }
 0x2ae   : > { %s1653_s17 = sld [smem:[#allocation14_spill]] }
 0x2af   : > { %s1654_s29 = sld [smem:[#allocation17_spill]] }
 0x2b3   : > { %p24_p2 = scmp.ge.s32.totalorder %s1652_s30, 4  }
 0x2b4   : > { %s1656_s28 = smov %s1653_s17 }
 0x2b5   :  { %26 = sbr.rel (!%p24_p2) target bundleno = 9 (0x9), region = 114 }
 0x2ba   :  { %819 = vsyncpa [#allocation3], 1 }
 0x2bb   :  { %821 = vsyncpa [#allocation3 + $0x1], 1 }
 0x2bc   :  { %822 = vsyncpa [#allocation6], 1 }
 0x2bd   :  { %824 = vsyncpa [#allocation6 + $0x1], 1 }
 0x2be   :  { %825 = vsyncpa [#allocation4], 1 }
 0x2bf   :  { %827 = vsyncpa [#allocation4 + $0x1], 1 }

</bundles_post_ra>
